<compile_context>
chip_gen: v7x
topology: tpu7x:2x2x1
jax: 0.10.0
libtpu: 0.0.40
codegen_flags: <defaults>
</compile_context>

<pallas_src>
import jax
import jax.numpy as jnp
from jax import lax
from jax.experimental import pallas as pl
from jax.experimental.pallas import tpu as pltpu


# ----------------------------- Pallas kernel -----------------------------

def lstm_tagger_kernel(x_ref, wih_ref, whh_ref, b_ref, wtag_ref, btag_ref,
                       out_ref):
    # Shapes (all static):
    #   x_ref    : (S*B, F)    time-major inputs, flattened over (S, B)
    #   wih_ref  : (F, 4H)     input->gates weight, gate order [i, f, o, g]
    #   whh_ref  : (H, 4H)     hidden->gates weight, gate order [i, f, o, g]
    #   b_ref    : (1, 4H)     fused bias (b_ih + b_hh), reordered
    #   wtag_ref : (1, H)      hidden2tag weight row
    #   btag_ref : (1,)        hidden2tag bias (SMEM scalar)
    #   out_ref  : (B, S)      lane-dense tag output (time on the lane axis)
    B, S = out_ref.shape
    H = whh_ref.shape[0]

    # Hoisted input projection for the whole sequence: one MXU fire.
    xg = jnp.dot(x_ref[...], wih_ref[...],
                 preferred_element_type=jnp.float32) + b_ref[...]   # (S*B, 4H)

    whh = whh_ref[...]                                              # (H, 4H)
    wtag = wtag_ref[...]                                            # (1, H)
    h = jnp.zeros((B, H), jnp.float32)
    c = jnp.zeros((B, H), jnp.float32)

    tag_cols = []
    for t in range(S):                       # static S -> fully unrolled
        gates = xg[t * B:(t + 1) * B, :] + jnp.dot(
            h, whh, preferred_element_type=jnp.float32)             # (B, 4H)
        ifo = jax.nn.sigmoid(gates[:, :3 * H])   # one EUP slab: i, f, o
        g = jnp.tanh(gates[:, 3 * H:])           # one EUP slab: g
        i_g = ifo[:, 0 * H:1 * H]
        f_g = ifo[:, 1 * H:2 * H]
        o_g = ifo[:, 2 * H:3 * H]
        c = f_g * c + i_g * g
        h = o_g * jnp.tanh(c)
        # hidden2tag per step: (B, 1) lane reduction, off the serial chain.
        tag_cols.append(jnp.sum(h * wtag, axis=-1, keepdims=True))

    # Single lane-dense store of the whole (B, S) output.
    out_ref[...] = jnp.concatenate(tag_cols, axis=1) + btag_ref[0]


# ----------------------------- parameter preprocessing (one-time) -----------------------------

def prepare_params(w_ih, w_hh, b_ih, b_hh, w_tag, b_tag):
    """One-time preprocessing of PyTorch-layout parameters.

    w_ih (4H, F), w_hh (4H, H), b_ih (4H,), b_hh (4H,), w_tag (1, H), b_tag (1,).
    Returns kernel-layout arrays; call ONCE when parameters are created/loaded,
    not per forward call.
    """
    H = w_hh.shape[1]

    def reorder_gates(a):
        # PyTorch gate order [i, f, g, o] -> [i, f, o, g] so the kernel applies
        # one sigmoid over 3H and one tanh over H.
        i, f, g, o = jnp.split(jnp.asarray(a, jnp.float32), 4, axis=0)
        return jnp.concatenate([i, f, o, g], axis=0)

    wih_t = reorder_gates(w_ih).T                                   # (F, 4H)
    whh_t = reorder_gates(w_hh).T                                   # (H, 4H)
    bias = reorder_gates(jnp.asarray(b_ih, jnp.float32)
                         + jnp.asarray(b_hh, jnp.float32)).reshape(1, 4 * H)
    wtag_row = jnp.asarray(w_tag, jnp.float32).reshape(1, H)
    btag = jnp.asarray(b_tag, jnp.float32).reshape(1,)
    return (wih_t, whh_t, bias, wtag_row, btag)


# ----------------------------- forward (hot path, jitted) -----------------------------

@jax.jit
def lstm_tagger_forward(x, params):
    """x: (S, B, F) float32, params from prepare_params().  Returns (S, B, 1)."""
    wih_t, whh_t, bias, wtag_row, btag = params
    S, B, F = x.shape
    H = whh_t.shape[0]

    # Fill the sublane / MXU-row dimension: pad B up to a multiple of 8
    # (f32 sublane count).  Padded rows compute throwaway values and are
    # sliced off; the serial recurrence latency is unchanged.
    B_pad = max(8, ((B + 7) // 8) * 8)
    x32 = jnp.asarray(x, jnp.float32)
    if B_pad != B:
        x32 = jnp.pad(x32, ((0, 0), (0, B_pad - B), (0, 0)))
    x2d = x32.reshape(S * B_pad, F)                                 # (S*B_pad, F)

    out_bs = pl.pallas_call(
        lstm_tagger_kernel,
        out_shape=jax.ShapeDtypeStruct((B_pad, S), jnp.float32),
        in_specs=[
            pl.BlockSpec(memory_space=pltpu.MemorySpace.VMEM),   # x2d
            pl.BlockSpec(memory_space=pltpu.MemorySpace.VMEM),   # W_ih^T
            pl.BlockSpec(memory_space=pltpu.MemorySpace.VMEM),   # W_hh^T
            pl.BlockSpec(memory_space=pltpu.MemorySpace.VMEM),   # fused bias
            pl.BlockSpec(memory_space=pltpu.MemorySpace.VMEM),   # w_tag row
            pl.BlockSpec(memory_space=pltpu.MemorySpace.SMEM),   # b_tag scalar
        ],
        out_specs=pl.BlockSpec(memory_space=pltpu.MemorySpace.VMEM),
    )(x2d, wih_t, whh_t, bias, wtag_row, btag)                      # (B_pad, S)

    # Back to the module's (S, B, 1) layout -- fused inside this jit.
    return out_bs[:B].transpose(1, 0)[:, :, None]


# ----------------------------- pure-JAX reference -----------------------------

def lstm_tagger_reference(x, w_ih, w_hh, b_ih, b_hh, w_tag, b_tag):
    S, B, F = x.shape
    H = w_hh.shape[1]
    bias = b_ih + b_hh

    def step(carry, x_t):
        h, c = carry
        gates = x_t @ w_ih.T + h @ w_hh.T + bias
        i = jax.nn.sigmoid(gates[:, 0 * H:1 * H])
        f = jax.nn.sigmoid(gates[:, 1 * H:2 * H])
        g = jnp.tanh(gates[:, 2 * H:3 * H])
        o = jax.nn.sigmoid(gates[:, 3 * H:4 * H])
        c_new = f * c + i * g
        h_new = o * jnp.tanh(c_new)
        return (h_new, c_new), h_new

    h0 = jnp.zeros((B, H), jnp.float32)
    c0 = jnp.zeros((B, H), jnp.float32)
    _, hs = lax.scan(step, (h0, c0), x)          # (S, B, H)
    return hs @ w_tag.T + b_tag                  # (S, B, 1)


# ----------------------------- main -----------------------------

if __name__ == "__main__":
    # 8 independent sequences packed into the batch axis (fills f32 sublanes).
    SEQ, BATCH, FEATURE, HIDDEN = 8, 8, 8, 32

    key = jax.random.PRNGKey(0)
    k = jax.random.split(key, 8)
    bound = 1.0 / jnp.sqrt(HIDDEN)

    # PyTorch nn.LSTM / nn.Linear default init: uniform(-1/sqrt(H), 1/sqrt(H))
    w_ih = jax.random.uniform(k[0], (4 * HIDDEN, FEATURE), jnp.float32, -bound, bound)
    w_hh = jax.random.uniform(k[1], (4 * HIDDEN, HIDDEN), jnp.float32, -bound, bound)
    b_ih = jax.random.uniform(k[2], (4 * HIDDEN,), jnp.float32, -bound, bound)
    b_hh = jax.random.uniform(k[3], (4 * HIDDEN,), jnp.float32, -bound, bound)
    w_tag = jax.random.uniform(k[4], (1, HIDDEN), jnp.float32, -bound, bound)
    b_tag = jax.random.uniform(k[5], (1,), jnp.float32, -bound, bound)

    x = jax.random.normal(k[6], (SEQ, BATCH, FEATURE), jnp.float32)

    # One-time parameter preprocessing (NOT in the per-call hot path).
    params = prepare_params(w_ih, w_hh, b_ih, b_hh, w_tag, b_tag)

    out = lstm_tagger_forward(x, params)
    out = jax.block_until_ready(out)

    ref = lstm_tagger_reference(x, w_ih, w_hh, b_ih, b_hh, w_tag, b_tag)
    assert out.shape == (SEQ, BATCH, 1)
    # Tolerance accounts for TPU MXU f32 matmuls being decomposed into bf16
    # passes (same path taken by the XLA reference); functional bugs would be
    # orders of magnitude larger.
    err = float(jnp.max(jnp.abs(out - ref)))
    assert jnp.allclose(out, ref, atol=1e-4, rtol=1e-4), f"mismatch vs reference (max abs err {err})"

    print("KERNEL_OK")
</pallas_src>

<mosaic_0001>
module attributes {stable_mosaic.version = 11 : i64} {
  func.func @lstm_tagger_kernel(%arg0: memref<64x8xf32, #tpu.memory_space<vmem>>, %arg1: memref<8x128xf32, #tpu.memory_space<vmem>>, %arg2: memref<32x128xf32, #tpu.memory_space<vmem>>, %arg3: memref<1x128xf32, #tpu.memory_space<vmem>>, %arg4: memref<1x32xf32, #tpu.memory_space<vmem>>, %arg5: memref<1xf32, #tpu.memory_space<smem>>, %arg6: memref<8x8xf32, #tpu.memory_space<vmem>>) attributes {dimension_semantics = [], scalar_prefetch = 0 : i64, scratch_operands = 0 : i64, tpu.core_type = #tpu.core_type<tc>} {
    %c0 = arith.constant 0 : index
    %c0_0 = arith.constant 0 : index
    %0 = vector.load %arg0[%c0, %c0_0] : memref<64x8xf32, #tpu.memory_space<vmem>>, vector<64x8xf32>
    %c0_1 = arith.constant 0 : index
    %c0_2 = arith.constant 0 : index
    %1 = vector.load %arg1[%c0_1, %c0_2] : memref<8x128xf32, #tpu.memory_space<vmem>>, vector<8x128xf32>
    %cst = arith.constant dense<0.000000e+00> : vector<64x128xf32>
    %2 = tpu.matmul %0, %1, %cst {dimension_numbers = #tpu.dot_dimension_numbers<[1], [0], [0], [1], [0, 0, 1, 1], [], []>} : vector<64x8xf32>, vector<8x128xf32>, vector<64x128xf32> -> vector<64x128xf32>
    %c0_3 = arith.constant 0 : index
    %c0_4 = arith.constant 0 : index
    %3 = vector.load %arg3[%c0_3, %c0_4] : memref<1x128xf32, #tpu.memory_space<vmem>>, vector<1x128xf32>
    %4 = vector.broadcast %3 : vector<1x128xf32> to vector<64x128xf32>
    %5 = arith.addf %2, %4 : vector<64x128xf32>
    %c0_5 = arith.constant 0 : index
    %c0_6 = arith.constant 0 : index
    %6 = vector.load %arg2[%c0_5, %c0_6] : memref<32x128xf32, #tpu.memory_space<vmem>>, vector<32x128xf32>
    %c0_7 = arith.constant 0 : index
    %c0_8 = arith.constant 0 : index
    %7 = vector.load %arg4[%c0_7, %c0_8] : memref<1x32xf32, #tpu.memory_space<vmem>>, vector<1x32xf32>
    %cst_9 = arith.constant 0.000000e+00 : f32
    %8 = vector.broadcast %cst_9 : f32 to vector<8x32xf32>
    %cst_10 = arith.constant 0.000000e+00 : f32
    %9 = vector.broadcast %cst_10 : f32 to vector<8x32xf32>
    %10 = vector.extract_strided_slice %5 {offsets = [0, 0], sizes = [8, 128], strides = [1, 1]} : vector<64x128xf32> to vector<8x128xf32>
    %cst_11 = arith.constant dense<0.000000e+00> : vector<8x128xf32>
    %11 = tpu.matmul %8, %6, %cst_11 {dimension_numbers = #tpu.dot_dimension_numbers<[1], [0], [0], [1], [0, 0, 1, 1], [], []>} : vector<8x32xf32>, vector<32x128xf32>, vector<8x128xf32> -> vector<8x128xf32>
    %12 = arith.addf %10, %11 : vector<8x128xf32>
    %13 = vector.extract_strided_slice %12 {offsets = [0, 0], sizes = [8, 96], strides = [1, 1]} : vector<8x128xf32> to vector<8x96xf32>
    %14 = arith.negf %13 : vector<8x96xf32>
    %15 = math.exp %14 : vector<8x96xf32>
    %cst_12 = arith.constant 1.000000e+00 : f32
    %16 = vector.broadcast %cst_12 : f32 to vector<8x96xf32>
    %17 = arith.addf %16, %15 : vector<8x96xf32>
    %18 = arith.divf %16, %17 : vector<8x96xf32>
    %19 = vector.extract_strided_slice %12 {offsets = [0, 96], sizes = [8, 32], strides = [1, 1]} : vector<8x128xf32> to vector<8x32xf32>
    %20 = math.tanh %19 : vector<8x32xf32>
    %21 = vector.extract_strided_slice %18 {offsets = [0, 0], sizes = [8, 32], strides = [1, 1]} : vector<8x96xf32> to vector<8x32xf32>
    %22 = vector.extract_strided_slice %18 {offsets = [0, 32], sizes = [8, 32], strides = [1, 1]} : vector<8x96xf32> to vector<8x32xf32>
    %23 = vector.extract_strided_slice %18 {offsets = [0, 64], sizes = [8, 32], strides = [1, 1]} : vector<8x96xf32> to vector<8x32xf32>
    %24 = arith.mulf %22, %9 : vector<8x32xf32>
    %25 = arith.mulf %21, %20 : vector<8x32xf32>
    %26 = arith.addf %24, %25 : vector<8x32xf32>
    %27 = math.tanh %26 : vector<8x32xf32>
    %28 = arith.mulf %23, %27 : vector<8x32xf32>
    %29 = vector.broadcast %7 : vector<1x32xf32> to vector<8x32xf32>
    %30 = arith.mulf %28, %29 : vector<8x32xf32>
    %cst_13 = arith.constant dense<0.000000e+00> : vector<8xf32>
    %31 = vector.multi_reduction <add>, %30, %cst_13 [1] : vector<8x32xf32> to vector<8xf32>
    %32 = vector.shape_cast %31 : vector<8xf32> to vector<8x1xf32>
    %33 = vector.extract_strided_slice %5 {offsets = [8, 0], sizes = [8, 128], strides = [1, 1]} : vector<64x128xf32> to vector<8x128xf32>
    %cst_14 = arith.constant dense<0.000000e+00> : vector<8x128xf32>
    %34 = tpu.matmul %28, %6, %cst_14 {dimension_numbers = #tpu.dot_dimension_numbers<[1], [0], [0], [1], [0, 0, 1, 1], [], []>} : vector<8x32xf32>, vector<32x128xf32>, vector<8x128xf32> -> vector<8x128xf32>
    %35 = arith.addf %33, %34 : vector<8x128xf32>
    %36 = vector.extract_strided_slice %35 {offsets = [0, 0], sizes = [8, 96], strides = [1, 1]} : vector<8x128xf32> to vector<8x96xf32>
    %37 = arith.negf %36 : vector<8x96xf32>
    %38 = math.exp %37 : vector<8x96xf32>
    %cst_15 = arith.constant 1.000000e+00 : f32
    %39 = vector.broadcast %cst_15 : f32 to vector<8x96xf32>
    %40 = arith.addf %39, %38 : vector<8x96xf32>
    %41 = arith.divf %39, %40 : vector<8x96xf32>
    %42 = vector.extract_strided_slice %35 {offsets = [0, 96], sizes = [8, 32], strides = [1, 1]} : vector<8x128xf32> to vector<8x32xf32>
    %43 = math.tanh %42 : vector<8x32xf32>
    %44 = vector.extract_strided_slice %41 {offsets = [0, 0], sizes = [8, 32], strides = [1, 1]} : vector<8x96xf32> to vector<8x32xf32>
    %45 = vector.extract_strided_slice %41 {offsets = [0, 32], sizes = [8, 32], strides = [1, 1]} : vector<8x96xf32> to vector<8x32xf32>
    %46 = vector.extract_strided_slice %41 {offsets = [0, 64], sizes = [8, 32], strides = [1, 1]} : vector<8x96xf32> to vector<8x32xf32>
    %47 = arith.mulf %45, %26 : vector<8x32xf32>
    %48 = arith.mulf %44, %43 : vector<8x32xf32>
    %49 = arith.addf %47, %48 : vector<8x32xf32>
    %50 = math.tanh %49 : vector<8x32xf32>
    %51 = arith.mulf %46, %50 : vector<8x32xf32>
    %52 = vector.broadcast %7 : vector<1x32xf32> to vector<8x32xf32>
    %53 = arith.mulf %51, %52 : vector<8x32xf32>
    %cst_16 = arith.constant dense<0.000000e+00> : vector<8xf32>
    %54 = vector.multi_reduction <add>, %53, %cst_16 [1] : vector<8x32xf32> to vector<8xf32>
    %55 = vector.shape_cast %54 : vector<8xf32> to vector<8x1xf32>
    %56 = vector.extract_strided_slice %5 {offsets = [16, 0], sizes = [8, 128], strides = [1, 1]} : vector<64x128xf32> to vector<8x128xf32>
    %cst_17 = arith.constant dense<0.000000e+00> : vector<8x128xf32>
    %57 = tpu.matmul %51, %6, %cst_17 {dimension_numbers = #tpu.dot_dimension_numbers<[1], [0], [0], [1], [0, 0, 1, 1], [], []>} : vector<8x32xf32>, vector<32x128xf32>, vector<8x128xf32> -> vector<8x128xf32>
    %58 = arith.addf %56, %57 : vector<8x128xf32>
    %59 = vector.extract_strided_slice %58 {offsets = [0, 0], sizes = [8, 96], strides = [1, 1]} : vector<8x128xf32> to vector<8x96xf32>
    %60 = arith.negf %59 : vector<8x96xf32>
    %61 = math.exp %60 : vector<8x96xf32>
    %cst_18 = arith.constant 1.000000e+00 : f32
    %62 = vector.broadcast %cst_18 : f32 to vector<8x96xf32>
    %63 = arith.addf %62, %61 : vector<8x96xf32>
    %64 = arith.divf %62, %63 : vector<8x96xf32>
    %65 = vector.extract_strided_slice %58 {offsets = [0, 96], sizes = [8, 32], strides = [1, 1]} : vector<8x128xf32> to vector<8x32xf32>
    %66 = math.tanh %65 : vector<8x32xf32>
    %67 = vector.extract_strided_slice %64 {offsets = [0, 0], sizes = [8, 32], strides = [1, 1]} : vector<8x96xf32> to vector<8x32xf32>
    %68 = vector.extract_strided_slice %64 {offsets = [0, 32], sizes = [8, 32], strides = [1, 1]} : vector<8x96xf32> to vector<8x32xf32>
    %69 = vector.extract_strided_slice %64 {offsets = [0, 64], sizes = [8, 32], strides = [1, 1]} : vector<8x96xf32> to vector<8x32xf32>
    %70 = arith.mulf %68, %49 : vector<8x32xf32>
    %71 = arith.mulf %67, %66 : vector<8x32xf32>
    %72 = arith.addf %70, %71 : vector<8x32xf32>
    %73 = math.tanh %72 : vector<8x32xf32>
    %74 = arith.mulf %69, %73 : vector<8x32xf32>
    %75 = vector.broadcast %7 : vector<1x32xf32> to vector<8x32xf32>
    %76 = arith.mulf %74, %75 : vector<8x32xf32>
    %cst_19 = arith.constant dense<0.000000e+00> : vector<8xf32>
    %77 = vector.multi_reduction <add>, %76, %cst_19 [1] : vector<8x32xf32> to vector<8xf32>
    %78 = vector.shape_cast %77 : vector<8xf32> to vector<8x1xf32>
    %79 = vector.extract_strided_slice %5 {offsets = [24, 0], sizes = [8, 128], strides = [1, 1]} : vector<64x128xf32> to vector<8x128xf32>
    %cst_20 = arith.constant dense<0.000000e+00> : vector<8x128xf32>
    %80 = tpu.matmul %74, %6, %cst_20 {dimension_numbers = #tpu.dot_dimension_numbers<[1], [0], [0], [1], [0, 0, 1, 1], [], []>} : vector<8x32xf32>, vector<32x128xf32>, vector<8x128xf32> -> vector<8x128xf32>
    %81 = arith.addf %79, %80 : vector<8x128xf32>
    %82 = vector.extract_strided_slice %81 {offsets = [0, 0], sizes = [8, 96], strides = [1, 1]} : vector<8x128xf32> to vector<8x96xf32>
    %83 = arith.negf %82 : vector<8x96xf32>
    %84 = math.exp %83 : vector<8x96xf32>
    %cst_21 = arith.constant 1.000000e+00 : f32
    %85 = vector.broadcast %cst_21 : f32 to vector<8x96xf32>
    %86 = arith.addf %85, %84 : vector<8x96xf32>
    %87 = arith.divf %85, %86 : vector<8x96xf32>
    %88 = vector.extract_strided_slice %81 {offsets = [0, 96], sizes = [8, 32], strides = [1, 1]} : vector<8x128xf32> to vector<8x32xf32>
    %89 = math.tanh %88 : vector<8x32xf32>
    %90 = vector.extract_strided_slice %87 {offsets = [0, 0], sizes = [8, 32], strides = [1, 1]} : vector<8x96xf32> to vector<8x32xf32>
    %91 = vector.extract_strided_slice %87 {offsets = [0, 32], sizes = [8, 32], strides = [1, 1]} : vector<8x96xf32> to vector<8x32xf32>
    %92 = vector.extract_strided_slice %87 {offsets = [0, 64], sizes = [8, 32], strides = [1, 1]} : vector<8x96xf32> to vector<8x32xf32>
    %93 = arith.mulf %91, %72 : vector<8x32xf32>
    %94 = arith.mulf %90, %89 : vector<8x32xf32>
    %95 = arith.addf %93, %94 : vector<8x32xf32>
    %96 = math.tanh %95 : vector<8x32xf32>
    %97 = arith.mulf %92, %96 : vector<8x32xf32>
    %98 = vector.broadcast %7 : vector<1x32xf32> to vector<8x32xf32>
    %99 = arith.mulf %97, %98 : vector<8x32xf32>
    %cst_22 = arith.constant dense<0.000000e+00> : vector<8xf32>
    %100 = vector.multi_reduction <add>, %99, %cst_22 [1] : vector<8x32xf32> to vector<8xf32>
    %101 = vector.shape_cast %100 : vector<8xf32> to vector<8x1xf32>
    %102 = vector.extract_strided_slice %5 {offsets = [32, 0], sizes = [8, 128], strides = [1, 1]} : vector<64x128xf32> to vector<8x128xf32>
    %cst_23 = arith.constant dense<0.000000e+00> : vector<8x128xf32>
    %103 = tpu.matmul %97, %6, %cst_23 {dimension_numbers = #tpu.dot_dimension_numbers<[1], [0], [0], [1], [0, 0, 1, 1], [], []>} : vector<8x32xf32>, vector<32x128xf32>, vector<8x128xf32> -> vector<8x128xf32>
    %104 = arith.addf %102, %103 : vector<8x128xf32>
    %105 = vector.extract_strided_slice %104 {offsets = [0, 0], sizes = [8, 96], strides = [1, 1]} : vector<8x128xf32> to vector<8x96xf32>
    %106 = arith.negf %105 : vector<8x96xf32>
    %107 = math.exp %106 : vector<8x96xf32>
    %cst_24 = arith.constant 1.000000e+00 : f32
    %108 = vector.broadcast %cst_24 : f32 to vector<8x96xf32>
    %109 = arith.addf %108, %107 : vector<8x96xf32>
    %110 = arith.divf %108, %109 : vector<8x96xf32>
    %111 = vector.extract_strided_slice %104 {offsets = [0, 96], sizes = [8, 32], strides = [1, 1]} : vector<8x128xf32> to vector<8x32xf32>
    %112 = math.tanh %111 : vector<8x32xf32>
    %113 = vector.extract_strided_slice %110 {offsets = [0, 0], sizes = [8, 32], strides = [1, 1]} : vector<8x96xf32> to vector<8x32xf32>
    %114 = vector.extract_strided_slice %110 {offsets = [0, 32], sizes = [8, 32], strides = [1, 1]} : vector<8x96xf32> to vector<8x32xf32>
    %115 = vector.extract_strided_slice %110 {offsets = [0, 64], sizes = [8, 32], strides = [1, 1]} : vector<8x96xf32> to vector<8x32xf32>
    %116 = arith.mulf %114, %95 : vector<8x32xf32>
    %117 = arith.mulf %113, %112 : vector<8x32xf32>
    %118 = arith.addf %116, %117 : vector<8x32xf32>
    %119 = math.tanh %118 : vector<8x32xf32>
    %120 = arith.mulf %115, %119 : vector<8x32xf32>
    %121 = vector.broadcast %7 : vector<1x32xf32> to vector<8x32xf32>
    %122 = arith.mulf %120, %121 : vector<8x32xf32>
    %cst_25 = arith.constant dense<0.000000e+00> : vector<8xf32>
    %123 = vector.multi_reduction <add>, %122, %cst_25 [1] : vector<8x32xf32> to vector<8xf32>
    %124 = vector.shape_cast %123 : vector<8xf32> to vector<8x1xf32>
    %125 = vector.extract_strided_slice %5 {offsets = [40, 0], sizes = [8, 128], strides = [1, 1]} : vector<64x128xf32> to vector<8x128xf32>
    %cst_26 = arith.constant dense<0.000000e+00> : vector<8x128xf32>
    %126 = tpu.matmul %120, %6, %cst_26 {dimension_numbers = #tpu.dot_dimension_numbers<[1], [0], [0], [1], [0, 0, 1, 1], [], []>} : vector<8x32xf32>, vector<32x128xf32>, vector<8x128xf32> -> vector<8x128xf32>
    %127 = arith.addf %125, %126 : vector<8x128xf32>
    %128 = vector.extract_strided_slice %127 {offsets = [0, 0], sizes = [8, 96], strides = [1, 1]} : vector<8x128xf32> to vector<8x96xf32>
    %129 = arith.negf %128 : vector<8x96xf32>
    %130 = math.exp %129 : vector<8x96xf32>
    %cst_27 = arith.constant 1.000000e+00 : f32
    %131 = vector.broadcast %cst_27 : f32 to vector<8x96xf32>
    %132 = arith.addf %131, %130 : vector<8x96xf32>
    %133 = arith.divf %131, %132 : vector<8x96xf32>
    %134 = vector.extract_strided_slice %127 {offsets = [0, 96], sizes = [8, 32], strides = [1, 1]} : vector<8x128xf32> to vector<8x32xf32>
    %135 = math.tanh %134 : vector<8x32xf32>
    %136 = vector.extract_strided_slice %133 {offsets = [0, 0], sizes = [8, 32], strides = [1, 1]} : vector<8x96xf32> to vector<8x32xf32>
    %137 = vector.extract_strided_slice %133 {offsets = [0, 32], sizes = [8, 32], strides = [1, 1]} : vector<8x96xf32> to vector<8x32xf32>
    %138 = vector.extract_strided_slice %133 {offsets = [0, 64], sizes = [8, 32], strides = [1, 1]} : vector<8x96xf32> to vector<8x32xf32>
    %139 = arith.mulf %137, %118 : vector<8x32xf32>
    %140 = arith.mulf %136, %135 : vector<8x32xf32>
    %141 = arith.addf %139, %140 : vector<8x32xf32>
    %142 = math.tanh %141 : vector<8x32xf32>
    %143 = arith.mulf %138, %142 : vector<8x32xf32>
    %144 = vector.broadcast %7 : vector<1x32xf32> to vector<8x32xf32>
    %145 = arith.mulf %143, %144 : vector<8x32xf32>
    %cst_28 = arith.constant dense<0.000000e+00> : vector<8xf32>
    %146 = vector.multi_reduction <add>, %145, %cst_28 [1] : vector<8x32xf32> to vector<8xf32>
    %147 = vector.shape_cast %146 : vector<8xf32> to vector<8x1xf32>
    %148 = vector.extract_strided_slice %5 {offsets = [48, 0], sizes = [8, 128], strides = [1, 1]} : vector<64x128xf32> to vector<8x128xf32>
    %cst_29 = arith.constant dense<0.000000e+00> : vector<8x128xf32>
    %149 = tpu.matmul %143, %6, %cst_29 {dimension_numbers = #tpu.dot_dimension_numbers<[1], [0], [0], [1], [0, 0, 1, 1], [], []>} : vector<8x32xf32>, vector<32x128xf32>, vector<8x128xf32> -> vector<8x128xf32>
    %150 = arith.addf %148, %149 : vector<8x128xf32>
    %151 = vector.extract_strided_slice %150 {offsets = [0, 0], sizes = [8, 96], strides = [1, 1]} : vector<8x128xf32> to vector<8x96xf32>
    %152 = arith.negf %151 : vector<8x96xf32>
    %153 = math.exp %152 : vector<8x96xf32>
    %cst_30 = arith.constant 1.000000e+00 : f32
    %154 = vector.broadcast %cst_30 : f32 to vector<8x96xf32>
    %155 = arith.addf %154, %153 : vector<8x96xf32>
    %156 = arith.divf %154, %155 : vector<8x96xf32>
    %157 = vector.extract_strided_slice %150 {offsets = [0, 96], sizes = [8, 32], strides = [1, 1]} : vector<8x128xf32> to vector<8x32xf32>
    %158 = math.tanh %157 : vector<8x32xf32>
    %159 = vector.extract_strided_slice %156 {offsets = [0, 0], sizes = [8, 32], strides = [1, 1]} : vector<8x96xf32> to vector<8x32xf32>
    %160 = vector.extract_strided_slice %156 {offsets = [0, 32], sizes = [8, 32], strides = [1, 1]} : vector<8x96xf32> to vector<8x32xf32>
    %161 = vector.extract_strided_slice %156 {offsets = [0, 64], sizes = [8, 32], strides = [1, 1]} : vector<8x96xf32> to vector<8x32xf32>
    %162 = arith.mulf %160, %141 : vector<8x32xf32>
    %163 = arith.mulf %159, %158 : vector<8x32xf32>
    %164 = arith.addf %162, %163 : vector<8x32xf32>
    %165 = math.tanh %164 : vector<8x32xf32>
    %166 = arith.mulf %161, %165 : vector<8x32xf32>
    %167 = vector.broadcast %7 : vector<1x32xf32> to vector<8x32xf32>
    %168 = arith.mulf %166, %167 : vector<8x32xf32>
    %cst_31 = arith.constant dense<0.000000e+00> : vector<8xf32>
    %169 = vector.multi_reduction <add>, %168, %cst_31 [1] : vector<8x32xf32> to vector<8xf32>
    %170 = vector.shape_cast %169 : vector<8xf32> to vector<8x1xf32>
    %171 = vector.extract_strided_slice %5 {offsets = [56, 0], sizes = [8, 128], strides = [1, 1]} : vector<64x128xf32> to vector<8x128xf32>
    %cst_32 = arith.constant dense<0.000000e+00> : vector<8x128xf32>
    %172 = tpu.matmul %166, %6, %cst_32 {dimension_numbers = #tpu.dot_dimension_numbers<[1], [0], [0], [1], [0, 0, 1, 1], [], []>} : vector<8x32xf32>, vector<32x128xf32>, vector<8x128xf32> -> vector<8x128xf32>
    %173 = arith.addf %171, %172 : vector<8x128xf32>
    %174 = vector.extract_strided_slice %173 {offsets = [0, 0], sizes = [8, 96], strides = [1, 1]} : vector<8x128xf32> to vector<8x96xf32>
    %175 = arith.negf %174 : vector<8x96xf32>
    %176 = math.exp %175 : vector<8x96xf32>
    %cst_33 = arith.constant 1.000000e+00 : f32
    %177 = vector.broadcast %cst_33 : f32 to vector<8x96xf32>
    %178 = arith.addf %177, %176 : vector<8x96xf32>
    %179 = arith.divf %177, %178 : vector<8x96xf32>
    %180 = vector.extract_strided_slice %173 {offsets = [0, 96], sizes = [8, 32], strides = [1, 1]} : vector<8x128xf32> to vector<8x32xf32>
    %181 = math.tanh %180 : vector<8x32xf32>
    %182 = vector.extract_strided_slice %179 {offsets = [0, 0], sizes = [8, 32], strides = [1, 1]} : vector<8x96xf32> to vector<8x32xf32>
    %183 = vector.extract_strided_slice %179 {offsets = [0, 32], sizes = [8, 32], strides = [1, 1]} : vector<8x96xf32> to vector<8x32xf32>
    %184 = vector.extract_strided_slice %179 {offsets = [0, 64], sizes = [8, 32], strides = [1, 1]} : vector<8x96xf32> to vector<8x32xf32>
    %185 = arith.mulf %183, %164 : vector<8x32xf32>
    %186 = arith.mulf %182, %181 : vector<8x32xf32>
    %187 = arith.addf %185, %186 : vector<8x32xf32>
    %188 = math.tanh %187 : vector<8x32xf32>
    %189 = arith.mulf %184, %188 : vector<8x32xf32>
    %190 = vector.broadcast %7 : vector<1x32xf32> to vector<8x32xf32>
    %191 = arith.mulf %189, %190 : vector<8x32xf32>
    %cst_34 = arith.constant dense<0.000000e+00> : vector<8xf32>
    %192 = vector.multi_reduction <add>, %191, %cst_34 [1] : vector<8x32xf32> to vector<8xf32>
    %193 = vector.shape_cast %192 : vector<8xf32> to vector<8x1xf32>
    %194 = tpu.concatenate %32, %55, %78, %101, %124, %147, %170, %193 in 1 : vector<8x1xf32>, vector<8x1xf32>, vector<8x1xf32>, vector<8x1xf32>, vector<8x1xf32>, vector<8x1xf32>, vector<8x1xf32>, vector<8x1xf32> -> vector<8x8xf32>
    %c0_35 = arith.constant 0 : index
    %195 = memref.load %arg5[%c0_35] : memref<1xf32, #tpu.memory_space<smem>>
    %196 = vector.broadcast %195 : f32 to vector<8x8xf32>
    %197 = arith.addf %194, %196 : vector<8x8xf32>
    %c0_36 = arith.constant 0 : index
    %c0_37 = arith.constant 0 : index
    %198 = vector.load %arg6[%c0_36, %c0_37] : memref<8x8xf32, #tpu.memory_space<vmem>>, vector<8x8xf32>
    tpu.vector_store %arg6[%c0_36, %c0_37], %197 {strides = array<i32>} : memref<8x8xf32, #tpu.memory_space<vmem>>, vector<8x8xf32>,
    return
  }
}

</mosaic_0001>

<bundles_post_ra>
// kernel: lstm_tagger_forward.1
= control target key start
LH: loop header
LB: loop body
LE: loop exit
PB: predicated region body
PF: predicated region fallthrough
CT: control target
= control target key end

     0   :  { %12 = vsyncpa [#allocation4], 0  ;;  %s1689_s0 = inlined_call_operand.hbm [shape: f32[64,8], index: 0, kind: input, shape index: {}]   ;;  %s1690_s1 = inlined_call_operand.vmem [shape: f32[8,128], index: 1, kind: input, shape index: {}]   ;;  %s1691_s2 = inlined_call_operand.hbm [shape: f32[32,128], index: 2, kind: input, shape index: {}]   ;;  %s1692_s3 = inlined_call_operand.vmem [shape: f32[1,128], index: 3, kind: input, shape index: {}]   ;;  %s1693_s4 = inlined_call_operand.vmem [shape: f32[1,32], index: 4, kind: input, shape index: {}]   ;;  %s1694_s5 = inlined_call_operand.<no memory space> [shape: f32[1], index: 5, kind: input, shape index: {}]   ;;  %s1695_s6 = inlined_call_operand.vmem [shape: f32[8,8], index: 6, kind: output, shape index: {}]  }
   0x1   :  { %13 = vsyncpa [#allocation6], 0  ;;  %s1443_s21 = smov [#allocation3]   ;;  %s1395_s25 = scalar_lea.hbm %s1689_s0, 1024 }
   0x2   :  { %s19_s22 = sshll.u32 %s1443_s21, 4  ;;  %p1396_p0 = scmp.ne.s32.totalorder %s1689_s0, %s1395_s25  ;;  %s20_s22 = int_to_ptr.vmem [resolvable:$true] %s19_s22 }
   0x3   :  { %p1399_p1 = scmp.lt.u32.totalorder %s1395_s25, %s1689_s0 }
   0x5   :  { %p1401_p2 = pnand %p1399_p1, %p1396_p0 }
   0x7   :  { %1404 = shalt.err (!%p1401_p2)
}
   0x8   :  { %s1405_s30 = scalar_lea.vmem %s20_s22, 1024  ;;  %p1410_p4 = scmp.lt.s32.totalorder %s20_s22, %s20_s22 }
   0x9   :  { %p1406_p3 = scmp.ne.s32.totalorder %s20_s22, %s1405_s30  ;;  %p1411_p5 = scmp.lt.s32.totalorder %s1405_s30, %s1405_s30 }
   0xb   :  { %p1412_p6 = por %p1411_p5, %p1410_p4 }
   0xd   :  { %p1413_p7 = pnand %p1412_p6, %p1406_p3 }
   0xf   :  { %1416 = shalt.err (!%p1413_p7)
}
  0x10   :  { %s1444_s7 = smov 128   ;;  %s1445_s8 = smov 8  }
  0x11   :  { %25 = dma.hbm_to_vmem [thread:$0]  %s1689_s0, 1024, %s20_s22, [#allocation4], %s1444_s7, %s1444_s7, %s1445_s8  }
  0x12   :  { %s1446_s11 = smov [#allocation5]   ;;  %s1417_s15 = scalar_lea.hbm %s1691_s2, 512 }
  0x13   :  { %s33_s12 = sshll.u32 %s1446_s11, 4  ;;  %p1418_p8 = scmp.ne.s32.totalorder %s1691_s2, %s1417_s15  ;;  %s34_s12 = int_to_ptr.vmem [resolvable:$true] %s33_s12 }
  0x14   :  { %p1421_p9 = scmp.lt.u32.totalorder %s1417_s15, %s1691_s2 }
  0x16   :  { %p1423_p10 = pnand %p1421_p9, %p1418_p8 }
  0x18   :  { %1426 = shalt.err (!%p1423_p10)
}
  0x19   :  { %s1427_s20 = scalar_lea.vmem %s34_s12, 512  ;;  %p1432_p12 = scmp.lt.s32.totalorder %s34_s12, %s34_s12 }
  0x1a   :  { %p1428_p11 = scmp.ne.s32.totalorder %s34_s12, %s1427_s20  ;;  %p1433_p13 = scmp.lt.s32.totalorder %s1427_s20, %s1427_s20 }
  0x1c   :  { %p1434_p0 = por %p1433_p13, %p1432_p12 }
  0x1e   :  { %p1435_p1 = pnand %p1434_p0, %p1428_p11 }
  0x20   :  { %1438 = shalt.err (!%p1435_p1)
}
  0x21   :  { %39 = dma.hbm_to_vmem [thread:$0]  %s1691_s2, 512, %s34_s12, [#allocation6], %s1444_s7, %s1444_s7, %s1445_s8  }
  0x22   :  { %1439 = dma.done.wait [#allocation4], 1024  }
  0x23   :  { %1440 = vsyncadd [#allocation4], 4294966272 }
  0x24   :  { %1441 = dma.done.wait [#allocation6], 512  }
  0x25   :  { %1442 = vsyncadd [#allocation6], 4294966784  ;;  %v1447_v0 = vmov 0.0|0.0   ;;  %vm1448_vm0 = vmmov 0   ;;  %v1449_v1 = vmov 0.0   ;;  %vm68_vm1 = vcmask 64512  }
  0x26   :  { %1274 = vmatprep.subr.bf16.mxu1 %v1447_v0  ;;  %1194 = vmatprep.mubr.msk.f32.mxu1 %vm1448_vm0, %v1449_v1  ;;  %v198_v2 = vld [vmem:[#allocation5] sm:$0xff]  ;;  %v199_v3 = vld [vmem:[#allocation5 + $0x8] sm:$0xff]  ;;  %v200_v8 = vld [vmem:[#allocation5 + $0x10] sm:$0xff]  ;;  %s1450_s24 = smov 32   ;;  %vm203_vm2 = vcmask 261120   ;;  %vm1074_vm3 = vcmask 7168  }
  0x27   :  { %v60_v4 = vld [vmem:[%s1690_s1] sm:$0xff]  ;;  %v1517_v5 = vpack.c.bf16 %v199_v3, %v198_v2  ;;  %v53_v7 = vld [vmem:[#allocation3 + $0x8] sm:$0xff]  ;;  %v201_v9 = vld [vmem:[#allocation5 + $0x18] sm:$0xff]  ;;  %vm1076_vm4 = vcmask 15360   ;;  %vm1078_vm5 = vcmask 23552   ;;  %vm1080_vm6 = vcmask 31744  }
  0x28   :  { %1172 = vmatprep.subr.mxu0 %v60_v4  ;;  %v52_v6 = vld [vmem:[#allocation3] sm:$0xff]  ;;  %v1522_v10 = vpack.c.bf16 %v201_v9, %v200_v8  ;;  %v54_v46 = vld [vmem:[#allocation3 + $0x10] sm:$0xff]  ;;  %v55_v47 = vld [vmem:[#allocation3 + $0x18] sm:$0xff]  ;;  %vm1082_vm7 = vcmask 39936   ;;  %vm1084_vm8 = vcmask 48128   ;;  %vm1086_vm9 = vcmask 56320  }
  0x29   :  { %1173 = vmatpush3.msra.mxu0 %v60_v4  ;;  %1174 = vmatprep.mubr.msk.f32.mxu0 %vm68_vm1, %v52_v6  ;;  %v1542_v12 = vld [vmem:[%s1692_s3] ss:$0 sm:$0xff]  ;;  %s1451_s3 = smov 64   ;;  %v57_v49 = vld [vmem:[#allocation3 + $0x28] sm:$0xff]  ;;  %v58_v50 = vld [vmem:[#allocation3 + $0x30] sm:$0xff] }
  0x2a   :  { %1276 = vmatpush3.bf16.msra.mxu1 %v1517_v5  ;;  %1175 = vmatmul.mubr.msk.f32.vlgmr.msra.gmra.mrb[0].mxu0 %vm68_vm1, %v53_v7  ;;  %v56_v48 = vld [vmem:[#allocation3 + $0x20] sm:$0xff]  ;;  %v59_v51 = vld [vmem:[#allocation3 + $0x38] sm:$0xff] }
  0x2b   :  { %1277 = vmatprep.subr.bf16.mxu1 %v1447_v0  ;;  %1286 = vmatprep.subr.bf16.mxu0 %v1447_v0 }
  0x2c   :  { %1288 = vmatpush3.bf16.msra.mxu0 %v1517_v5  ;;  %1177 = vmatprep.mubr.msk.f32.mxu0 %vm68_vm1, %v54_v46 }
  0x2d   :  { %1289 = vmatprep.subr.bf16.mxu0 %v1447_v0 }
  0x2e   :  { %1279 = vmatpush3.bf16.msra.mxu1 %v1522_v10  ;;  %1178 = vmatmul.mubr.msk.f32.gmra.mrb[2].mxu0 %vm68_vm1, %v55_v47 }
  0x2f   :  { %1280 = vmatprep.subr.bf16.mxu1 %v1447_v0  ;;  %1180 = vmatprep.mubr.msk.f32.mxu0 %vm68_vm1, %v56_v48 }
  0x30   :  { %1291 = vmatpush3.bf16.msra.mxu0 %v1522_v10 }
  0x31   :  { %1195 = vmatmul.mubr.f32.vlgmr.msra.gmra.mrb[0].mxu1 %v1449_v1  ;;  %1298 = vmatprep.subr.bf16.mxu0 %v1447_v0 }
  0x32   :  { %1282 = vmatpush3.bf16.msra.mxu1 %v1517_v5  ;;  %1205 = vmatprep.mubr.msk.f32.mxu1 %vm1448_vm0, %v1449_v1 }
  0x33   :  { %1283 = vmatprep.subr.bf16.mxu1 %v1447_v0  ;;  %1181 = vmatmul.mubr.msk.f32.gmra.mrb[4].mxu0 %vm68_vm1, %v57_v49 }
  0x34   :  { %1183 = vmatprep.mubr.msk.f32.mxu0 %vm68_vm1, %v58_v50 }
  0x36   :  { %1285 = vmatpush3.bf16.msra.mxu1 %v1522_v10 }
  0x37   :  { %1292 = vmatprep.subr.bf16.mxu1 %v1447_v0  ;;  %1184 = vmatmul.mubr.msk.f32.gmra.mrb[6].mxu0 %vm68_vm1, %v59_v51 }
  0x38   :  { %1216 = vmatprep.mubr.msk.f32.mxu0 %vm1448_vm0, %v1449_v1 }
  0xfd   :  { %v1176_v11 = vpop.f32.mrb[0].mxu0 }
  0xfe   :  { %v159_v13 = vpop.f32.mrb[1].mxu0  ;;  %v165_v32 = vadd.f32 %v1176_v11, %v1542_v12 }
  0xff   :  { %v160_v14 = vadd.f32 %v1542_v12, %v159_v13 }
 0x101   :  { %v1179_v55 = vpop.f32.mrb[2].mxu0 }
 0x102   :  { %v169_v56 = vpop.f32.mrb[3].mxu0 }
 0x103   :  { %v170_v62 = vadd.f32 %v1542_v12, %v169_v56 }
 0x104   :  { %v273_v15 = vpop.f32.mrb[0].mxu1 }
 0x105   :  { %v277_v16 = vadd.f32 %v273_v15, %v160_v14  ;;  %v1196_v17 = vpop.f32.mrb[1].mxu1 }
 0x106   :  { %v1575_v57 = vpop.f32.mrb[4].mxu0 }
 0x107   :  { %1331 = vtanh.f32 %v277_v16  ;;  %v1107_v19 = vmul.f32 -1.442695, %v277_v16  ;;  %v1577_v58 = vpop.f32.mrb[5].mxu0 }
 0x109   :  { %1333 = vpow2.f32 %v1107_v19 }
 0x10a   :  { %v1579_v59 = vpop.f32.mrb[6].mxu0 }
 0x10b   :  { %v1581_v60 = vpop.f32.mrb[7].mxu0 }
 0x111   :  { %v1332_v18 = vpop.eup %1331 }
 0x112   :  { %287 = vrot.lane.b32.xlu0 %v1332_v18, %s1450_s24 }
 0x113   :  { %v1334_v20 = vpop.eup %1333 }
 0x114   :  { %v281_v21 = vadd.f32 1.0, %v1334_v20 }
 0x116   :  { %1335 = vrcp.f32 %v281_v21  ;;  %v175_v21 = vadd.f32 %v1179_v55, %v1542_v12 }
 0x120   :  { %v1336_v22 = vpop.eup %1335 }
 0x121   :  { %v285_v25 = vmul.f32 0.0, %v1336_v22 }
 0x184   :  { %v288_v23 = vpop.permute.xlu0 %287 }
 0x185   :  { %v290_v24 = vmul.f32 %v1336_v22, %v288_v23 }
 0x187   :  { %292 = vrot.lane.b32.xlu0 %v290_v24, %s1450_s24 }
 0x1f9   :  { %v293_v26 = vpop.permute.xlu0 %292 }
 0x1fa   :  { %v295_v27 = vadd.f32 %v293_v26, %v285_v25 }
 0x1fc   :  { %1337 = vtanh.f32 %v295_v27 }
 0x206   :  { %v1338_v28 = vpop.eup %1337 }
 0x207   :  { %298 = vrot.lane.b32.xlu1 %v1338_v28, %s1450_s24 }
 0x279   :  { %v299_v29 = vpop.permute.xlu1 %298 }
 0x27a   :  { %v1548_v30 = vmul.f32 %v1336_v22, %v299_v29 }
 0x27c   :  { %319 = vrot.lane.b32.xlu1 %v1548_v30, %s1451_s3 }
 0x2ee   :  { %v320_v31 = vpop.permute.xlu1 %319 }
 0x2ef   :  { %1206 = vmatmul.mubr.msk.f32.vlgmr.msra.gmra.mrb[2].mxu1 %vm203_vm2, %v320_v31 }
 0x2f0   :  { %1294 = vmatpush3.bf16.msra.mxu1 %v1517_v5  ;;  %1227 = vmatprep.mubr.msk.f32.mxu1 %vm1448_vm0, %v1449_v1 }
 0x2f1   :  { %1295 = vmatprep.subr.bf16.mxu1 %v1447_v0 }
 0x2f4   :  { %1297 = vmatpush3.bf16.msra.mxu1 %v1522_v10 }
 0x2f5   :  { %1304 = vmatprep.subr.bf16.mxu1 %v1447_v0 }
 0x3c2   :  { %v389_v33 = vpop.f32.mrb[2].mxu1 }
 0x3c3   :  { %v393_v34 = vadd.f32 %v389_v33, %v165_v32  ;;  %v1207_v35 = vpop.f32.mrb[3].mxu1 }
 0x3c5   :  { %1339 = vtanh.f32 %v393_v34  ;;  %v1110_v37 = vmul.f32 -1.442695, %v393_v34 }
 0x3c7   :  { %1341 = vpow2.f32 %v1110_v37 }
 0x3cf   :  { %v1340_v36 = vpop.eup %1339 }
 0x3d0   :  { %403 = vrot.lane.b32.xlu0 %v1340_v36, %s1450_s24 }
 0x3d1   :  { %v1342_v38 = vpop.eup %1341 }
 0x3d2   :  { %v397_v39 = vadd.f32 1.0, %v1342_v38 }
 0x3d4   :  { %1343 = vrcp.f32 %v397_v39 }
 0x3de   :  { %v1344_v40 = vpop.eup %1343 }
 0x3df   :  { %v401_v43 = vmul.f32 %v1344_v40, %v295_v27 }
 0x442   :  { %v404_v41 = vpop.permute.xlu0 %403 }
 0x443   :  { %v406_v42 = vmul.f32 %v1344_v40, %v404_v41 }
 0x445   :  { %408 = vrot.lane.b32.xlu1 %v406_v42, %s1450_s24 }
 0x4b7   :  { %v409_v44 = vpop.permute.xlu1 %408 }
 0x4b8   :  { %v411_v45 = vadd.f32 %v409_v44, %v401_v43 }
 0x4ba   :  { %1345 = vtanh.f32 %v411_v45 }
 0x4c4   :  { %v1346_v52 = vpop.eup %1345 }
 0x4c5   :  { %414 = vrot.lane.b32.xlu0 %v1346_v52, %s1450_s24 }
 0x537   :  { %v415_v53 = vpop.permute.xlu0 %414 }
 0x538   :  { %v1571_v54 = vmul.f32 %v1344_v40, %v415_v53  ;;  %v180_v40 = vadd.f32 %v1542_v12, %v1577_v58 }
 0x53a   :  { %427 = vrot.lane.b32.xlu1 %v1571_v54, %s1451_s3 }
 0x5ac   :  { %v428_v61 = vpop.permute.xlu1 %427 }
 0x5ad   :  { %1217 = vmatmul.mubr.msk.f32.vlgmr.msra.gmra.mrb[8].mxu0 %vm203_vm2, %v428_v61 }
 0x5ae   :  { %1300 = vmatpush3.bf16.msra.mxu0 %v1517_v5  ;;  %1238 = vmatprep.mubr.msk.f32.mxu0 %vm1448_vm0, %v1449_v1 }
 0x5af   :  { %1301 = vmatprep.subr.bf16.mxu0 %v1447_v0 }
 0x5b2   :  { %1303 = vmatpush3.bf16.msra.mxu0 %v1522_v10 }
 0x5b3   :  { %1310 = vmatprep.subr.bf16.mxu0 %v1447_v0 }
 0x680   :  { %v497_v63 = vpop.f32.mrb[8].mxu0 }
 0x681   :  { %v501_v2 = vadd.f32 %v497_v63, %v170_v62  ;;  %v1218_v3 = vpop.f32.mrb[9].mxu0  ;;  %v185_v62 = vadd.f32 %v1575_v57, %v1542_v12 }
 0x683   :  { %1347 = vtanh.f32 %v501_v2  ;;  %v1112_v6 = vmul.f32 -1.442695, %v501_v2 }
 0x685   :  { %1349 = vpow2.f32 %v1112_v6 }
 0x68d   :  { %v1348_v4 = vpop.eup %1347 }
 0x68e   :  { %511 = vrot.lane.b32.xlu0 %v1348_v4, %s1450_s24 }
 0x68f   :  { %v1350_v7 = vpop.eup %1349 }
 0x690   :  { %v505_v8 = vadd.f32 1.0, %v1350_v7 }
 0x692   :  { %1351 = vrcp.f32 %v505_v8 }
 0x69c   :  { %v1352_v9 = vpop.eup %1351 }
 0x69d   :  { %v509_v14 = vmul.f32 %v1352_v9, %v411_v45 }
 0x700   :  { %v512_v11 = vpop.permute.xlu0 %511 }
 0x701   :  { %v514_v13 = vmul.f32 %v1352_v9, %v512_v11 }
 0x703   :  { %516 = vrot.lane.b32.xlu1 %v514_v13, %s1450_s24 }
 0x775   :  { %v517_v15 = vpop.permute.xlu1 %516 }
 0x776   :  { %v519_v16 = vadd.f32 %v517_v15, %v509_v14 }
 0x778   :  { %1353 = vtanh.f32 %v519_v16 }
 0x782   :  { %v1354_v17 = vpop.eup %1353 }
 0x783   :  { %522 = vrot.lane.b32.xlu0 %v1354_v17, %s1450_s24 }
 0x7f5   :  { %v523_v18 = vpop.permute.xlu0 %522 }
 0x7f6   :  { %v1594_v19 = vmul.f32 %v1352_v9, %v523_v18 }
 0x7f8   :  { %535 = vrot.lane.b32.xlu1 %v1594_v19, %s1451_s3 }
 0x86a   :  { %v536_v20 = vpop.permute.xlu1 %535 }
 0x86b   :  { %1228 = vmatmul.mubr.msk.f32.vlgmr.msra.gmra.mrb[4].mxu1 %vm203_vm2, %v536_v20 }
 0x86c   :  { %1306 = vmatpush3.bf16.msra.mxu1 %v1517_v5  ;;  %1249 = vmatprep.mubr.msk.f32.mxu1 %vm1448_vm0, %v1449_v1 }
 0x86d   :  { %1307 = vmatprep.subr.bf16.mxu1 %v1447_v0 }
 0x870   :  { %1309 = vmatpush3.bf16.msra.mxu1 %v1522_v10 }
 0x871   :  { %1316 = vmatprep.subr.bf16.mxu1 %v1447_v0 }
 0x93e   :  { %v605_v22 = vpop.f32.mrb[4].mxu1 }
 0x93f   :  { %v609_v23 = vadd.f32 %v605_v22, %v175_v21  ;;  %v1229_v24 = vpop.f32.mrb[5].mxu1 }
 0x941   :  { %1355 = vtanh.f32 %v609_v23  ;;  %v1114_v26 = vmul.f32 -1.442695, %v609_v23 }
 0x943   :  { %1357 = vpow2.f32 %v1114_v26 }
 0x94b   :  { %v1356_v25 = vpop.eup %1355 }
 0x94c   :  { %619 = vrot.lane.b32.xlu0 %v1356_v25, %s1450_s24 }
 0x94d   :  { %v1358_v27 = vpop.eup %1357 }
 0x94e   :  { %v613_v28 = vadd.f32 1.0, %v1358_v27 }
 0x950   :  { %1359 = vrcp.f32 %v613_v28 }
 0x95a   :  { %v1360_v29 = vpop.eup %1359 }
 0x95b   :  { %v617_v33 = vmul.f32 %v1360_v29, %v519_v16  ;;  %v190_v16 = vadd.f32 %v1542_v12, %v1581_v60 }
 0x9be   :  { %v620_v31 = vpop.permute.xlu0 %619 }
 0x9bf   :  { %v622_v32 = vmul.f32 %v1360_v29, %v620_v31 }
 0x9c1   :  { %624 = vrot.lane.b32.xlu1 %v622_v32, %s1450_s24 }
 0xa33   :  { %v625_v34 = vpop.permute.xlu1 %624 }
 0xa34   :  { %v627_v35 = vadd.f32 %v625_v34, %v617_v33 }
 0xa36   :  { %1361 = vtanh.f32 %v627_v35 }
 0xa40   :  { %v1362_v36 = vpop.eup %1361 }
 0xa41   :  { %630 = vrot.lane.b32.xlu0 %v1362_v36, %s1450_s24 }
 0xab3   :  { %v631_v37 = vpop.permute.xlu0 %630 }
 0xab4   :  { %v1609_v38 = vmul.f32 %v1360_v29, %v631_v37 }
 0xab6   :  { %643 = vrot.lane.b32.xlu1 %v1609_v38, %s1451_s3 }
 0xb28   :  { %v644_v39 = vpop.permute.xlu1 %643 }
 0xb29   :  { %1239 = vmatmul.mubr.msk.f32.vlgmr.msra.gmra.mrb[10].mxu0 %vm203_vm2, %v644_v39 }
 0xb2a   :  { %1312 = vmatpush3.bf16.msra.mxu0 %v1517_v5  ;;  %1260 = vmatprep.mubr.msk.f32.mxu0 %vm1448_vm0, %v1449_v1 }
 0xb2b   :  { %1313 = vmatprep.subr.bf16.mxu0 %v1447_v0 }
 0xb2e   :  { %1315 = vmatpush3.bf16.msra.mxu0 %v1522_v10 }
 0xbfc   :  { %v713_v41 = vpop.f32.mrb[10].mxu0 }
 0xbfd   :  { %v717_v42 = vadd.f32 %v713_v41, %v180_v40  ;;  %v1240_v43 = vpop.f32.mrb[11].mxu0  ;;  %v1108_v41 = vld [vmem:[%s1693_s4] ss:$0 sm:$0xff] }
 0xbff   :  { %1363 = vtanh.f32 %v717_v42  ;;  %v1116_v45 = vmul.f32 -1.442695, %v717_v42 }
 0xc01   :  { %1365 = vpow2.f32 %v1116_v45 }
 0xc09   :  { %v1364_v44 = vpop.eup %1363 }
 0xc0a   :  { %727 = vrot.lane.b32.xlu0 %v1364_v44, %s1450_s24 }
 0xc0b   :  { %v1366_v46 = vpop.eup %1365 }
 0xc0c   :  { %v721_v47 = vadd.f32 1.0, %v1366_v46 }
 0xc0e   :  { %1367 = vrcp.f32 %v721_v47 }
 0xc18   :  { %v1368_v48 = vpop.eup %1367 }
 0xc19   :  { %v725_v51 = vmul.f32 %v1368_v48, %v627_v35  ;;  %v195_v35 = vadd.f32 %v1579_v59, %v1542_v12 }
 0xc7c   :  { %v728_v49 = vpop.permute.xlu0 %727 }
 0xc7d   :  { %v730_v50 = vmul.f32 %v1368_v48, %v728_v49 }
 0xc7f   :  { %732 = vrot.lane.b32.xlu1 %v730_v50, %s1450_s24 }
 0xcf1   :  { %v733_v52 = vpop.permute.xlu1 %732 }
 0xcf2   :  { %v735_v53 = vadd.f32 %v733_v52, %v725_v51 }
 0xcf4   :  { %1369 = vtanh.f32 %v735_v53 }
 0xcfe   :  { %v1370_v55 = vpop.eup %1369 }
 0xcff   :  { %738 = vrot.lane.b32.xlu0 %v1370_v55, %s1450_s24 }
 0xd71   :  { %v739_v56 = vpop.permute.xlu0 %738 }
 0xd72   :  { %v1624_v58 = vmul.f32 %v1368_v48, %v739_v56 }
 0xd74   :  { %751 = vrot.lane.b32.xlu1 %v1624_v58, %s1451_s3 }
 0xde6   :  { %v752_v61 = vpop.permute.xlu1 %751 }
 0xde7   :  { %1250 = vmatmul.mubr.msk.f32.vlgmr.msra.gmra.mrb[6].mxu1 %vm203_vm2, %v752_v61 }
 0xde8   :  { %1318 = vmatpush3.bf16.msra.mxu1 %v1517_v5  ;;  %1271 = vmatprep.mubr.msk.f32.mxu1 %vm1448_vm0, %v1449_v1 }
 0xde9   :  { %1319 = vmatprep.subr.bf16.mxu1 %v1447_v0 }
 0xdec   :  { %1321 = vmatpush3.bf16.msra.mxu1 %v1522_v10 }
 0xeba   :  { %v821_v63 = vpop.f32.mrb[6].mxu1 }
 0xebb   :  { %v825_v2 = vadd.f32 %v821_v63, %v185_v62  ;;  %v1251_v3 = vpop.f32.mrb[7].mxu1 }
 0xebd   :  { %1371 = vtanh.f32 %v825_v2  ;;  %v1118_v6 = vmul.f32 -1.442695, %v825_v2 }
 0xebf   :  { %1373 = vpow2.f32 %v1118_v6 }
 0xec7   :  { %v1372_v4 = vpop.eup %1371 }
 0xec8   :  { %835 = vrot.lane.b32.xlu0 %v1372_v4, %s1450_s24 }
 0xec9   :  { %v1374_v5 = vpop.eup %1373 }
 0xeca   :  { %v829_v7 = vadd.f32 1.0, %v1374_v5 }
 0xecc   :  { %1375 = vrcp.f32 %v829_v7 }
 0xed6   :  { %v1376_v1 = vpop.eup %1375 }
 0xed7   :  { %v833_v10 = vmul.f32 %v1376_v1, %v735_v53 }
 0xf3a   :  { %v836_v8 = vpop.permute.xlu0 %835 }
 0xf3b   :  { %v838_v0 = vmul.f32 %v1376_v1, %v836_v8 }
 0xf3d   :  { %840 = vrot.lane.b32.xlu1 %v838_v0, %s1450_s24 }
 0xfaf   :  { %v841_v9 = vpop.permute.xlu1 %840 }
 0xfb0   :  { %v843_v57 = vadd.f32 %v841_v9, %v833_v10 }
 0xfb2   :  { %1377 = vtanh.f32 %v843_v57 }
 0xfbc   :  { %v1378_v11 = vpop.eup %1377 }
 0xfbd   :  { %846 = vrot.lane.b32.xlu0 %v1378_v11, %s1450_s24 }
0x102f   :  { %v847_v13 = vpop.permute.xlu0 %846 }
0x1030   :  { %v1639_v14 = vmul.f32 %v1376_v1, %v847_v13 }
0x1032   :  { %859 = vrot.lane.b32.xlu1 %v1639_v14, %s1451_s3 }
0x10a4   :  { %v860_v15 = vpop.permute.xlu1 %859 }
0x10a5   :  { %1261 = vmatmul.mubr.msk.f32.vlgmr.msra.gmra.mrb[12].mxu0 %vm203_vm2, %v860_v15 }
0x1178   :  { %v929_v17 = vpop.f32.mrb[12].mxu0 }
0x1179   :  { %v933_v18 = vadd.f32 %v929_v17, %v190_v16  ;;  %v1262_v20 = vpop.f32.mrb[13].mxu0 }
0x117b   :  { %1379 = vtanh.f32 %v933_v18  ;;  %v1120_v22 = vmul.f32 -1.442695, %v933_v18 }
0x117d   :  { %1381 = vpow2.f32 %v1120_v22 }
0x1185   :  { %v1380_v21 = vpop.eup %1379 }
0x1186   :  { %943 = vrot.lane.b32.xlu0 %v1380_v21, %s1450_s24 }
0x1187   :  { %v1382_v23 = vpop.eup %1381 }
0x1188   :  { %v937_v24 = vadd.f32 1.0, %v1382_v23 }
0x118a   :  { %1383 = vrcp.f32 %v937_v24 }
0x1194   :  { %v1384_v25 = vpop.eup %1383 }
0x1195   :  { %v941_v28 = vmul.f32 %v1384_v25, %v843_v57 }
0x11f8   :  { %v944_v26 = vpop.permute.xlu0 %943 }
0x11f9   :  { %v946_v27 = vmul.f32 %v1384_v25, %v944_v26 }
0x11fb   :  { %948 = vrot.lane.b32.xlu1 %v946_v27, %s1450_s24 }
0x126d   :  { %v949_v29 = vpop.permute.xlu1 %948 }
0x126e   :  { %v951_v60 = vadd.f32 %v949_v29, %v941_v28 }
0x1270   :  { %1385 = vtanh.f32 %v951_v60 }
0x127a   :  { %v1386_v31 = vpop.eup %1385 }
0x127b   :  { %954 = vrot.lane.b32.xlu0 %v1386_v31, %s1450_s24 }
0x12ed   :  { %v955_v32 = vpop.permute.xlu0 %954 }
0x12ee   :  { %v957_v33 = vmul.f32 %v1384_v25, %v955_v32  ;;  %v1089_v25 = vstv %s1694_s5 }
0x12f0   :  { %967 = vrot.lane.b32.xlu1 %v957_v33, %s1451_s3 }
0x1362   :  { %v968_v34 = vpop.permute.xlu1 %967 }
0x1363   :  { %1272 = vmatmul.mubr.msk.f32.vlgmr.msra.gmra.mrb[8].mxu1 %vm203_vm2, %v968_v34 }
0x1436   :  { %v1037_v36 = vpop.f32.mrb[8].mxu1 }
0x1437   :  { %v1041_v37 = vadd.f32 %v1037_v36, %v195_v35  ;;  %v1273_v39 = vpop.f32.mrb[9].mxu1 }
0x1439   :  { %1387 = vtanh.f32 %v1041_v37  ;;  %v1122_v42 = vmul.f32 -1.442695, %v1041_v37 }
0x143b   :  { %1389 = vpow2.f32 %v1122_v42 }
0x1443   :  { %v1388_v40 = vpop.eup %1387 }
0x1444   :  { %1051 = vrot.lane.b32.xlu0 %v1388_v40, %s1450_s24 }
0x1445   :  { %v1390_v43 = vpop.eup %1389 }
0x1446   :  { %v1045_v44 = vadd.f32 1.0, %v1390_v43 }
0x1448   :  { %307 = vrot.lane.b32.xlu0 %v1108_v41, %s1451_s3  ;;  %1391 = vrcp.f32 %v1045_v44 }
0x1452   :  { %v1392_v45 = vpop.eup %1391 }
0x1453   :  { %v1049_v48 = vmul.f32 %v1392_v45, %v951_v60 }
0x14b6   :  { %v1052_v12 = vpop.permute.xlu0 %1051 }
0x14b7   :  { %v1054_v59 = vmul.f32 %v1392_v45, %v1052_v12 }
0x14b9   :  { %1056 = vrot.lane.b32.xlu1 %v1054_v59, %s1450_s24 }
0x14ba   :  { %v308_v46 = vpop.permute.xlu0 %307 }
0x14bb   :  { %v310_v47 = vmul.f32 %v308_v46, %v1548_v30  ;;  %v418_v55 = vmul.f32 %v1571_v54, %v308_v46  ;;  %v526_v56 = vmul.f32 %v1594_v19, %v308_v46  ;;  %v742_v30 = vmul.f32 %v1624_v58, %v308_v46 }
0x14bc   :  { %v850_v61 = vmul.f32 %v1639_v14, %v308_v46  ;;  %v958_v62 = vmul.f32 %v957_v33, %v308_v46  ;;  %v634_v0 = vmul.f32 %v1609_v38, %v308_v46 }
0x14bd   :  { %312 = vrot.lane.b32.xlu1 %v310_v47, %s1451_s3 }
0x152b   :  { %v1057_v49 = vpop.permute.xlu1 %1056 }
0x152c   :  { %v1059_v50 = vadd.f32 %v1057_v49, %v1049_v48 }
0x152e   :  { %1393 = vtanh.f32 %v1059_v50 }
0x152f   :  { %v313_v51 = vpop.permute.xlu1 %312 }
0x1530   :  { %v315_v52 = vsel %vm203_vm2, %v313_v51, 0.0 }
0x1531   :  { %316 = vadd.xlane.f32.xlu0 %v315_v52 }
0x1538   :  { %v1394_v53 = vpop.eup %1393 }
0x1539   :  { %1062 = vrot.lane.b32.xlu1 %v1394_v53, %s1450_s24 }
0x153d   :  { %420 = vrot.lane.b32.xlu1 %v418_v55, %s1451_s3 }
0x1547   :  { %528 = vrot.lane.b32.xlu0 %v526_v56, %s1451_s3 }
0x154b   :  { %744 = vrot.lane.b32.xlu0 %v742_v30, %s1451_s3 }
0x154f   :  { %852 = vrot.lane.b32.xlu0 %v850_v61, %s1451_s3 }
0x1553   :  { %960 = vrot.lane.b32.xlu0 %v958_v62, %s1451_s3 }
0x15ab   :  { %v1063_v63 = vpop.permute.xlu1 %1062 }
0x15ac   :  { %v1065_v2 = vmul.f32 %v1392_v45, %v1063_v63 }
0x15ae   :  { %v1066_v54 = vmul.f32 %v1065_v2, %v308_v46 }
0x15af   :  { %v421_v3 = vpop.permute.xlu1 %420 }
0x15b0   :  { %1068 = vrot.lane.b32.xlu0 %v1066_v54, %s1451_s3  ;;  %v423_v19 = vsel %vm203_vm2, %v421_v3, 0.0 }
0x15b1   :  { %424 = vadd.xlane.f32.xlu1 %v423_v19 }
0x15be   :  { %v317_v4 = vpop.xlane.xlu0 %316 }
0x15c2   :  { %v529_v58 = vpop.permute.xlu0 %528 }
0x15c3   :  { %v531_v6 = vsel %vm203_vm2, %v529_v58, 0.0 }
0x15c4   :  { %532 = vadd.xlane.f32.xlu1 %v531_v6 }
0x15c6   :  { %v745_v5 = vpop.permute.xlu0 %744 }
0x15c7   :  { %v747_v7 = vsel %vm203_vm2, %v745_v5, 0.0 }
0x15ca   :  { %v853_v1 = vpop.permute.xlu0 %852 }
0x15cb   :  { %v855_v8 = vsel %vm203_vm2, %v853_v1, 0.0 }
0x15ce   :  { %v961_v10 = vpop.permute.xlu0 %960 }
0x15cf   :  { %748 = vadd.xlane.f32.xlu0 %v747_v7  ;;  %v963_v18 = vsel %vm203_vm2, %v961_v10, 0.0 }
0x15d3   :  { %856 = vadd.xlane.f32.xlu0 %v855_v8 }
0x15d5   :  { %636 = vrot.lane.b32.xlu1 %v634_v0, %s1451_s3 }
0x1622   :  { %v1069_v9 = vpop.permute.xlu0 %1068 }
0x1623   :  { %v1071_v57 = vsel %vm203_vm2, %v1069_v9, 0.0 }
0x1624   :  { %1072 = vadd.xlane.f32.xlu0 %v1071_v57 }
0x163e   :  { %v425_v11 = vpop.xlane.xlu1 %424 }
0x163f   :  { %v1075_v13 = vsel %vm1074_vm3, %v317_v4, %v425_v11 }
0x1651   :  { %v533_v14 = vpop.xlane.xlu1 %532 }
0x1652   :  { %v1077_v15 = vsel %vm1076_vm4, %v1075_v13, %v533_v14 }
0x1655   :  { %v637_v16 = vpop.permute.xlu1 %636 }
0x1656   :  { %v639_v17 = vsel %vm203_vm2, %v637_v16, 0.0 }
0x1657   :  { %640 = vadd.xlane.f32.xlu1 %v639_v17 }
0x165b   :  { %964 = vadd.xlane.f32.xlu1 %v963_v18 }
0x165c   :  { %v749_v38 = vpop.xlane.xlu0 %748 }
0x1660   :  { %v857_v21 = vpop.xlane.xlu0 %856 }
0x16b1   :  { %v1073_v27 = vpop.xlane.xlu0 %1072 }
0x16e4   :  { %v641_v20 = vpop.xlane.xlu1 %640 }
0x16e5   :  { %v1079_v22 = vsel %vm1078_vm5, %v1077_v15, %v641_v20 }
0x16e6   :  { %v1081_v23 = vsel %vm1080_vm6, %v1079_v22, %v749_v38 }
0x16e7   :  { %v1083_v24 = vsel %vm1082_vm7, %v1081_v23, %v857_v21 }
0x16e8   :  { %v965_v26 = vpop.xlane.xlu1 %964 }
0x16e9   :  { %v1085_v28 = vsel %vm1084_vm8, %v1083_v24, %v965_v26 }
0x16ea   :  { %v1087_v29 = vsel %vm1086_vm9, %v1085_v28, %v1073_v27 }
0x16eb   :  { %v1090_v60 = vadd.f32 %v1089_v25, %v1087_v29 }
0x16ed   :  { %1091 = vst.msk [vmem:[%s1695_s6] sm:$0xff] %vm68_vm1, %v1090_v60 }
0x16ee   :  { %1096 = vsyncpa [#allocation4], 1 }
0x16ef   :  { %1097 = vsyncpa [#allocation6], 1 }

</bundles_post_ra>
